<compile_context>
chip_gen: v5e
topology: v5e:2x2
jax: 0.10.0
libtpu: 0.0.40
codegen_flags: <defaults>
</compile_context>

<pallas_src>
import functools

import jax
import jax.numpy as jnp
from jax.experimental import pallas as pl
from jax.experimental.pallas import tpu as pltpu

BATCH_SIZE = 1      # matches the PyTorch module's init_hidden()
_LANES = 128
_SUBLANES = 8
_CHUNK = 8          # time steps per unrolled group / batched store
_STATIC_CHUNK_LIMIT = 16  # <=16 chunks (128 steps): fully static Python unroll


def _round_up(x, m):
    return ((x + m - 1) // m) * m


def make_rnn_kernel(num_layers, seq_len, hidden_pad):
    num_full = seq_len // _CHUNK
    rem = seq_len % _CHUNK
    hoist_whh = hidden_pad <= _LANES  # keep W_hh in vregs only when it fits comfortably

    def kernel(*refs):
        # refs layout:
        #   x_ref (Tp, Fp),
        #   per layer l: wih_ref (in_pad, Hp), whh_ref (Hp, Hp), bias_ref (1, Hp),
        #   fc_w_ref (Hp, Op), fc_b_ref (1, Op),
        #   out_ref (Tp, Op), hid_ref (L, Hp),
        #   seq_scratch (Tp, Hp), gates_scratch (Tp, Hp)
        x_ref = refs[0]
        idx = 1
        layer_refs = []
        for _ in range(num_layers):
            layer_refs.append(refs[idx:idx + 3])
            idx += 3
        fc_w_ref, fc_b_ref = refs[idx], refs[idx + 1]
        idx += 2
        out_ref, hid_ref = refs[idx], refs[idx + 1]
        idx += 2
        seq_scratch, gates_scratch = refs[idx], refs[idx + 1]

        # Zero once so padded rows (>= seq_len) of seq_scratch are well defined for the
        # next layer's gates GEMM and the fc head (those output rows are sliced off).
        seq_scratch[...] = jnp.zeros_like(seq_scratch)

        # Static Python loop over layers (num_layers is small & static).
        for l in range(num_layers):
            wih_ref, whh_ref, bias_ref = layer_refs[l]
            in_ref = x_ref if l == 0 else seq_scratch

            # Hoisted input projection + fused bias over ALL timesteps: one MXU GEMM
            # + one (Tp, Hp) VPU add, off the serial critical path.
            gates_scratch[...] = (
                jnp.dot(in_ref[...], wih_ref[...],
                        preferred_element_type=jnp.float32)
                + bias_ref[...])

            # (Hp, Hp) recurrent weight in vregs for the whole layer when small.
            whh_hoisted = whh_ref[...] if hoist_whh else None

            def run_chunk(base_t, h, n_steps):
                # n_steps is static; base_t may be static or dynamic (multiple of 8).
                # Load W_hh at most once per chunk (not per step) when it can't live
                # in vregs across the layer.
                w = whh_hoisted if hoist_whh else whh_ref[...]
                rows = []
                for i in range(n_steps):
                    g = gates_scratch[pl.ds(base_t + i, 1), :]          # (1, Hp) vld
                    h = jnp.tanh(
                        g + jnp.dot(h, w, preferred_element_type=jnp.float32))
                    rows.append(h)
                # One lane-dense, sublane-aligned (n_steps, Hp) store per chunk
                # instead of n_steps masked (1, Hp) stores.
                seq_scratch[pl.ds(base_t, n_steps), :] = jnp.concatenate(rows, axis=0)
                return h

            h = jnp.zeros((1, hidden_pad), jnp.float32)

            if num_full > 0:
                if num_full <= _STATIC_CHUNK_LIMIT:
                    # Fully static unroll: constant, aligned slice starts everywhere.
                    for c in range(num_full):
                        h = run_chunk(c * _CHUNK, h, _CHUNK)
                else:
                    # Long sequences: rolled loop over chunks, 8-step unrolled body.
                    def chunk_body(c, h_carry):
                        base = pl.multiple_of(c * _CHUNK, _CHUNK)
                        return run_chunk(base, h_carry, _CHUNK)
                    h = jax.lax.fori_loop(0, num_full, chunk_body, h)

            if rem > 0:
                h = run_chunk(num_full * _CHUNK, h, rem)

            hid_ref[pl.ds(l, 1), :] = h

        # Final linear head over all timesteps of the last layer: (Tp,Hp) @ (Hp,Op) + b
        out_ref[...] = (
            jnp.dot(seq_scratch[...], fc_w_ref[...],
                    preferred_element_type=jnp.float32)
            + fc_b_ref[...])

    return kernel


def prepare_params(params, *, input_size, hidden_size, output_size, num_layers):
    """One-time weight prep: transpose + zero-pad to lane-dense shapes (done outside
    the per-call path so each forward pays no extra transpose/pad kernels)."""
    Hp = _round_up(hidden_size, _LANES)
    Fp = _round_up(input_size, _LANES)
    Op = _round_up(output_size, _LANES)

    layers = []
    for l, (w_ih, w_hh, b_ih, b_hh) in enumerate(params["layers"]):
        in_dim = input_size if l == 0 else hidden_size
        in_pad = Fp if l == 0 else Hp
        wih_t = jnp.zeros((in_pad, Hp), jnp.float32).at[:in_dim, :hidden_size].set(
            jnp.transpose(w_ih).astype(jnp.float32))
        whh_t = jnp.zeros((Hp, Hp), jnp.float32).at[:hidden_size, :hidden_size].set(
            jnp.transpose(w_hh).astype(jnp.float32))
        bias = jnp.zeros((1, Hp), jnp.float32).at[0, :hidden_size].set(
            (b_ih + b_hh).astype(jnp.float32))
        layers.append((wih_t, whh_t, bias))

    fc_w = jnp.zeros((Hp, Op), jnp.float32).at[:hidden_size, :output_size].set(
        jnp.transpose(params["fc_w"]).astype(jnp.float32))
    fc_b = jnp.zeros((1, Op), jnp.float32).at[0, :output_size].set(
        params["fc_b"].astype(jnp.float32))
    return {"layers": layers, "fc_w": fc_w, "fc_b": fc_b}


def rnn_model_forward(x, prepped, *, hidden_size, num_layers, output_size):
    """x: (1, T, input_size) batch-first, batch must equal BATCH_SIZE=1."""
    assert x.shape[0] == BATCH_SIZE
    seq_len = x.shape[1]
    input_size = x.shape[2]

    Hp = _round_up(hidden_size, _LANES)
    Fp = _round_up(input_size, _LANES)
    Op = _round_up(output_size, _LANES)
    Tp = _round_up(seq_len, _SUBLANES)

    # Lane/sublane-padded time-major input slab.
    x2d = jnp.zeros((Tp, Fp), jnp.float32).at[:seq_len, :input_size].set(
        x[0].astype(jnp.float32))

    call_args = [x2d]
    for (wih_t, whh_t, bias) in prepped["layers"]:
        call_args.extend((wih_t, whh_t, bias))
    call_args.append(prepped["fc_w"])
    call_args.append(prepped["fc_b"])

    vmem_spec = pl.BlockSpec(memory_space=pltpu.MemorySpace.VMEM)

    # TODO(synk): for very long seq_len on v7x (64 MiB VMEM), tile T with a grid axis
    # carrying h across chunks; current whole-sequence-resident layout is fine at these sizes.
    out_p, hid_p = pl.pallas_call(
        make_rnn_kernel(num_layers, seq_len, Hp),
        out_shape=(
            jax.ShapeDtypeStruct((Tp, Op), jnp.float32),
            jax.ShapeDtypeStruct((num_layers, Hp), jnp.float32),
        ),
        in_specs=[vmem_spec] * len(call_args),
        out_specs=(vmem_spec, vmem_spec),
        scratch_shapes=[
            pltpu.VMEM((Tp, Hp), jnp.float32),   # seq_scratch (layer outputs)
            pltpu.VMEM((Tp, Hp), jnp.float32),   # gates_scratch (hoisted input proj)
        ],
    )(*call_args)

    out = out_p[:seq_len, :output_size]
    hid = hid_p[:, :hidden_size].reshape(num_layers, BATCH_SIZE, hidden_size)
    # PyTorch returns (output.view(T*B, -1) -> fc, hidden_state (L, B, H))
    return out, hid


def rnn_model_reference(x, params, *, hidden_size, num_layers, output_size):
    """Pure-JAX reference mirroring torch.nn.RNN(tanh, batch_first) + Linear."""
    inp = x[0].astype(jnp.float32)  # (T, F)
    final_h = []
    for (w_ih, w_hh, b_ih, b_hh) in params["layers"]:
        def step(h, x_t, w_ih=w_ih, w_hh=w_hh, b_ih=b_ih, b_hh=b_hh):
            h_new = jnp.tanh(x_t @ w_ih.T + b_ih + h @ w_hh.T + b_hh)
            return h_new, h_new
        h_last, outs = jax.lax.scan(step, jnp.zeros((hidden_size,), jnp.float32), inp)
        final_h.append(h_last)
        inp = outs
    out = inp @ params["fc_w"].T + params["fc_b"]
    return out, jnp.stack(final_h)[:, None, :]


def init_params(key, input_size, hidden_size, output_size, num_layers):
    k = 1.0 / jnp.sqrt(jnp.float32(hidden_size))
    layers = []
    for l in range(num_layers):
        in_dim = input_size if l == 0 else hidden_size
        key, k1, k2, k3, k4 = jax.random.split(key, 5)
        layers.append((
            jax.random.uniform(k1, (hidden_size, in_dim), jnp.float32, -k, k),       # weight_ih_l{l}
            jax.random.uniform(k2, (hidden_size, hidden_size), jnp.float32, -k, k),  # weight_hh_l{l}
            jax.random.uniform(k3, (hidden_size,), jnp.float32, -k, k),              # bias_ih_l{l}
            jax.random.uniform(k4, (hidden_size,), jnp.float32, -k, k),              # bias_hh_l{l}
        ))
    key, kf1, kf2 = jax.random.split(key, 3)
    kf = 1.0 / jnp.sqrt(jnp.float32(hidden_size))
    fc_w = jax.random.uniform(kf1, (output_size, hidden_size), jnp.float32, -kf, kf)
    fc_b = jax.random.uniform(kf2, (output_size,), jnp.float32, -kf, kf)
    return {"layers": layers, "fc_w": fc_w, "fc_b": fc_b}


if __name__ == "__main__":
    input_size, hidden_size, output_size, num_layers = 16, 32, 8, 2
    seq_len = 8

    key = jax.random.PRNGKey(0)
    key, kx, kp = jax.random.split(key, 3)
    x = jax.random.normal(kx, (BATCH_SIZE, seq_len, input_size), jnp.float32)
    params = init_params(kp, input_size, hidden_size, output_size, num_layers)

    # One-time weight preparation (transpose + pad), outside the per-call path.
    prepped = prepare_params(params, input_size=input_size, hidden_size=hidden_size,
                             output_size=output_size, num_layers=num_layers)

    fwd = jax.jit(functools.partial(rnn_model_forward, hidden_size=hidden_size,
                                    num_layers=num_layers, output_size=output_size))
    out, hid = fwd(x, prepped)
    out = jax.block_until_ready(out)
    hid = jax.block_until_ready(hid)

    ref_out, ref_hid = rnn_model_reference(x, params, hidden_size=hidden_size,
                                           num_layers=num_layers, output_size=output_size)
    assert out.shape == (seq_len * BATCH_SIZE, output_size)
    assert hid.shape == (num_layers, BATCH_SIZE, hidden_size)
    assert jnp.allclose(out, ref_out, atol=1e-4, rtol=1e-4)
    assert jnp.allclose(hid, ref_hid, atol=1e-4, rtol=1e-4)

    print("KERNEL_OK")
</pallas_src>

<mosaic_0001>
module attributes {stable_mosaic.version = 11 : i64} {
  func.func @kernel(%arg0: memref<8x128xf32, #tpu.memory_space<vmem>>, %arg1: memref<128x128xf32, #tpu.memory_space<vmem>>, %arg2: memref<128x128xf32, #tpu.memory_space<vmem>>, %arg3: memref<1x128xf32, #tpu.memory_space<vmem>>, %arg4: memref<128x128xf32, #tpu.memory_space<vmem>>, %arg5: memref<128x128xf32, #tpu.memory_space<vmem>>, %arg6: memref<1x128xf32, #tpu.memory_space<vmem>>, %arg7: memref<128x128xf32, #tpu.memory_space<vmem>>, %arg8: memref<1x128xf32, #tpu.memory_space<vmem>>, %arg9: memref<8x128xf32, #tpu.memory_space<vmem>>, %arg10: memref<2x128xf32, #tpu.memory_space<vmem>>, %arg11: memref<8x128xf32, #tpu.memory_space<vmem>>, %arg12: memref<8x128xf32, #tpu.memory_space<vmem>>) attributes {dimension_semantics = [], scalar_prefetch = 0 : i64, scratch_operands = 2 : i64, tpu.core_type = #tpu.core_type<tc>} {
    %cst = arith.constant 0.000000e+00 : f32
    %0 = vector.broadcast %cst : f32 to vector<8x128xf32>
    %c0 = arith.constant 0 : index
    %c0_0 = arith.constant 0 : index
    %1 = vector.load %arg11[%c0, %c0_0] : memref<8x128xf32, #tpu.memory_space<vmem>>, vector<8x128xf32>
    tpu.vector_store %arg11[%c0, %c0_0], %0 {strides = array<i32>} : memref<8x128xf32, #tpu.memory_space<vmem>>, vector<8x128xf32>,
    %c0_1 = arith.constant 0 : index
    %c0_2 = arith.constant 0 : index
    %2 = vector.load %arg0[%c0_1, %c0_2] : memref<8x128xf32, #tpu.memory_space<vmem>>, vector<8x128xf32>
    %c0_3 = arith.constant 0 : index
    %c0_4 = arith.constant 0 : index
    %3 = vector.load %arg1[%c0_3, %c0_4] : memref<128x128xf32, #tpu.memory_space<vmem>>, vector<128x128xf32>
    %cst_5 = arith.constant dense<0.000000e+00> : vector<8x128xf32>
    %4 = tpu.matmul %2, %3, %cst_5 {dimension_numbers = #tpu.dot_dimension_numbers<[1], [0], [0], [1], [0, 0, 1, 1], [], []>} : vector<8x128xf32>, vector<128x128xf32>, vector<8x128xf32> -> vector<8x128xf32>
    %c0_6 = arith.constant 0 : index
    %c0_7 = arith.constant 0 : index
    %5 = vector.load %arg3[%c0_6, %c0_7] : memref<1x128xf32, #tpu.memory_space<vmem>>, vector<1x128xf32>
    %6 = vector.broadcast %5 : vector<1x128xf32> to vector<8x128xf32>
    %7 = arith.addf %4, %6 : vector<8x128xf32>
    %c0_8 = arith.constant 0 : index
    %c0_9 = arith.constant 0 : index
    %8 = vector.load %arg12[%c0_8, %c0_9] : memref<8x128xf32, #tpu.memory_space<vmem>>, vector<8x128xf32>
    tpu.vector_store %arg12[%c0_8, %c0_9], %7 {strides = array<i32>} : memref<8x128xf32, #tpu.memory_space<vmem>>, vector<8x128xf32>,
    %c0_10 = arith.constant 0 : index
    %c0_11 = arith.constant 0 : index
    %9 = vector.load %arg2[%c0_10, %c0_11] : memref<128x128xf32, #tpu.memory_space<vmem>>, vector<128x128xf32>
    %cst_12 = arith.constant 0.000000e+00 : f32
    %10 = vector.broadcast %cst_12 : f32 to vector<1x128xf32>
    %c0_13 = arith.constant 0 : index
    %c0_14 = arith.constant 0 : index
    %11 = vector.load %arg12[%c0_13, %c0_14] : memref<8x128xf32, #tpu.memory_space<vmem>>, vector<1x128xf32>
    %cst_15 = arith.constant dense<0.000000e+00> : vector<1x128xf32>
    %12 = tpu.matmul %10, %9, %cst_15 {dimension_numbers = #tpu.dot_dimension_numbers<[1], [0], [0], [1], [0, 0, 1, 1], [], []>} : vector<1x128xf32>, vector<128x128xf32>, vector<1x128xf32> -> vector<1x128xf32>
    %13 = arith.addf %11, %12 : vector<1x128xf32>
    %14 = math.tanh %13 : vector<1x128xf32>
    %c1 = arith.constant 1 : index
    %c0_16 = arith.constant 0 : index
    %15 = vector.load %arg12[%c1, %c0_16] : memref<8x128xf32, #tpu.memory_space<vmem>>, vector<1x128xf32>
    %cst_17 = arith.constant dense<0.000000e+00> : vector<1x128xf32>
    %16 = tpu.matmul %14, %9, %cst_17 {dimension_numbers = #tpu.dot_dimension_numbers<[1], [0], [0], [1], [0, 0, 1, 1], [], []>} : vector<1x128xf32>, vector<128x128xf32>, vector<1x128xf32> -> vector<1x128xf32>
    %17 = arith.addf %15, %16 : vector<1x128xf32>
    %18 = math.tanh %17 : vector<1x128xf32>
    %c2 = arith.constant 2 : index
    %c0_18 = arith.constant 0 : index
    %19 = vector.load %arg12[%c2, %c0_18] : memref<8x128xf32, #tpu.memory_space<vmem>>, vector<1x128xf32>
    %cst_19 = arith.constant dense<0.000000e+00> : vector<1x128xf32>
    %20 = tpu.matmul %18, %9, %cst_19 {dimension_numbers = #tpu.dot_dimension_numbers<[1], [0], [0], [1], [0, 0, 1, 1], [], []>} : vector<1x128xf32>, vector<128x128xf32>, vector<1x128xf32> -> vector<1x128xf32>
    %21 = arith.addf %19, %20 : vector<1x128xf32>
    %22 = math.tanh %21 : vector<1x128xf32>
    %c3 = arith.constant 3 : index
    %c0_20 = arith.constant 0 : index
    %23 = vector.load %arg12[%c3, %c0_20] : memref<8x128xf32, #tpu.memory_space<vmem>>, vector<1x128xf32>
    %cst_21 = arith.constant dense<0.000000e+00> : vector<1x128xf32>
    %24 = tpu.matmul %22, %9, %cst_21 {dimension_numbers = #tpu.dot_dimension_numbers<[1], [0], [0], [1], [0, 0, 1, 1], [], []>} : vector<1x128xf32>, vector<128x128xf32>, vector<1x128xf32> -> vector<1x128xf32>
    %25 = arith.addf %23, %24 : vector<1x128xf32>
    %26 = math.tanh %25 : vector<1x128xf32>
    %c4 = arith.constant 4 : index
    %c0_22 = arith.constant 0 : index
    %27 = vector.load %arg12[%c4, %c0_22] : memref<8x128xf32, #tpu.memory_space<vmem>>, vector<1x128xf32>
    %cst_23 = arith.constant dense<0.000000e+00> : vector<1x128xf32>
    %28 = tpu.matmul %26, %9, %cst_23 {dimension_numbers = #tpu.dot_dimension_numbers<[1], [0], [0], [1], [0, 0, 1, 1], [], []>} : vector<1x128xf32>, vector<128x128xf32>, vector<1x128xf32> -> vector<1x128xf32>
    %29 = arith.addf %27, %28 : vector<1x128xf32>
    %30 = math.tanh %29 : vector<1x128xf32>
    %c5 = arith.constant 5 : index
    %c0_24 = arith.constant 0 : index
    %31 = vector.load %arg12[%c5, %c0_24] : memref<8x128xf32, #tpu.memory_space<vmem>>, vector<1x128xf32>
    %cst_25 = arith.constant dense<0.000000e+00> : vector<1x128xf32>
    %32 = tpu.matmul %30, %9, %cst_25 {dimension_numbers = #tpu.dot_dimension_numbers<[1], [0], [0], [1], [0, 0, 1, 1], [], []>} : vector<1x128xf32>, vector<128x128xf32>, vector<1x128xf32> -> vector<1x128xf32>
    %33 = arith.addf %31, %32 : vector<1x128xf32>
    %34 = math.tanh %33 : vector<1x128xf32>
    %c6 = arith.constant 6 : index
    %c0_26 = arith.constant 0 : index
    %35 = vector.load %arg12[%c6, %c0_26] : memref<8x128xf32, #tpu.memory_space<vmem>>, vector<1x128xf32>
    %cst_27 = arith.constant dense<0.000000e+00> : vector<1x128xf32>
    %36 = tpu.matmul %34, %9, %cst_27 {dimension_numbers = #tpu.dot_dimension_numbers<[1], [0], [0], [1], [0, 0, 1, 1], [], []>} : vector<1x128xf32>, vector<128x128xf32>, vector<1x128xf32> -> vector<1x128xf32>
    %37 = arith.addf %35, %36 : vector<1x128xf32>
    %38 = math.tanh %37 : vector<1x128xf32>
    %c7 = arith.constant 7 : index
    %c0_28 = arith.constant 0 : index
    %39 = vector.load %arg12[%c7, %c0_28] : memref<8x128xf32, #tpu.memory_space<vmem>>, vector<1x128xf32>
    %cst_29 = arith.constant dense<0.000000e+00> : vector<1x128xf32>
    %40 = tpu.matmul %38, %9, %cst_29 {dimension_numbers = #tpu.dot_dimension_numbers<[1], [0], [0], [1], [0, 0, 1, 1], [], []>} : vector<1x128xf32>, vector<128x128xf32>, vector<1x128xf32> -> vector<1x128xf32>
    %41 = arith.addf %39, %40 : vector<1x128xf32>
    %42 = math.tanh %41 : vector<1x128xf32>
    %43 = tpu.concatenate %14, %18, %22, %26, %30, %34, %38, %42 in 0 : vector<1x128xf32>, vector<1x128xf32>, vector<1x128xf32>, vector<1x128xf32>, vector<1x128xf32>, vector<1x128xf32>, vector<1x128xf32>, vector<1x128xf32> -> vector<8x128xf32>
    %c0_30 = arith.constant 0 : index
    %c0_31 = arith.constant 0 : index
    %44 = vector.load %arg11[%c0_30, %c0_31] : memref<8x128xf32, #tpu.memory_space<vmem>>, vector<8x128xf32>
    tpu.vector_store %arg11[%c0_30, %c0_31], %43 {strides = array<i32>} : memref<8x128xf32, #tpu.memory_space<vmem>>, vector<8x128xf32>,
    %c0_32 = arith.constant 0 : index
    %c0_33 = arith.constant 0 : index
    %45 = vector.load %arg10[%c0_32, %c0_33] : memref<2x128xf32, #tpu.memory_space<vmem>>, vector<1x128xf32>
    tpu.vector_store %arg10[%c0_32, %c0_33], %42 {strides = array<i32>} : memref<2x128xf32, #tpu.memory_space<vmem>>, vector<1x128xf32>,
    %c0_34 = arith.constant 0 : index
    %c0_35 = arith.constant 0 : index
    %46 = vector.load %arg11[%c0_34, %c0_35] : memref<8x128xf32, #tpu.memory_space<vmem>>, vector<8x128xf32>
    %c0_36 = arith.constant 0 : index
    %c0_37 = arith.constant 0 : index
    %47 = vector.load %arg4[%c0_36, %c0_37] : memref<128x128xf32, #tpu.memory_space<vmem>>, vector<128x128xf32>
    %cst_38 = arith.constant dense<0.000000e+00> : vector<8x128xf32>
    %48 = tpu.matmul %46, %47, %cst_38 {dimension_numbers = #tpu.dot_dimension_numbers<[1], [0], [0], [1], [0, 0, 1, 1], [], []>} : vector<8x128xf32>, vector<128x128xf32>, vector<8x128xf32> -> vector<8x128xf32>
    %c0_39 = arith.constant 0 : index
    %c0_40 = arith.constant 0 : index
    %49 = vector.load %arg6[%c0_39, %c0_40] : memref<1x128xf32, #tpu.memory_space<vmem>>, vector<1x128xf32>
    %50 = vector.broadcast %49 : vector<1x128xf32> to vector<8x128xf32>
    %51 = arith.addf %48, %50 : vector<8x128xf32>
    %c0_41 = arith.constant 0 : index
    %c0_42 = arith.constant 0 : index
    %52 = vector.load %arg12[%c0_41, %c0_42] : memref<8x128xf32, #tpu.memory_space<vmem>>, vector<8x128xf32>
    tpu.vector_store %arg12[%c0_41, %c0_42], %51 {strides = array<i32>} : memref<8x128xf32, #tpu.memory_space<vmem>>, vector<8x128xf32>,
    %c0_43 = arith.constant 0 : index
    %c0_44 = arith.constant 0 : index
    %53 = vector.load %arg5[%c0_43, %c0_44] : memref<128x128xf32, #tpu.memory_space<vmem>>, vector<128x128xf32>
    %cst_45 = arith.constant 0.000000e+00 : f32
    %54 = vector.broadcast %cst_45 : f32 to vector<1x128xf32>
    %c0_46 = arith.constant 0 : index
    %c0_47 = arith.constant 0 : index
    %55 = vector.load %arg12[%c0_46, %c0_47] : memref<8x128xf32, #tpu.memory_space<vmem>>, vector<1x128xf32>
    %cst_48 = arith.constant dense<0.000000e+00> : vector<1x128xf32>
    %56 = tpu.matmul %54, %53, %cst_48 {dimension_numbers = #tpu.dot_dimension_numbers<[1], [0], [0], [1], [0, 0, 1, 1], [], []>} : vector<1x128xf32>, vector<128x128xf32>, vector<1x128xf32> -> vector<1x128xf32>
    %57 = arith.addf %55, %56 : vector<1x128xf32>
    %58 = math.tanh %57 : vector<1x128xf32>
    %c1_49 = arith.constant 1 : index
    %c0_50 = arith.constant 0 : index
    %59 = vector.load %arg12[%c1_49, %c0_50] : memref<8x128xf32, #tpu.memory_space<vmem>>, vector<1x128xf32>
    %cst_51 = arith.constant dense<0.000000e+00> : vector<1x128xf32>
    %60 = tpu.matmul %58, %53, %cst_51 {dimension_numbers = #tpu.dot_dimension_numbers<[1], [0], [0], [1], [0, 0, 1, 1], [], []>} : vector<1x128xf32>, vector<128x128xf32>, vector<1x128xf32> -> vector<1x128xf32>
    %61 = arith.addf %59, %60 : vector<1x128xf32>
    %62 = math.tanh %61 : vector<1x128xf32>
    %c2_52 = arith.constant 2 : index
    %c0_53 = arith.constant 0 : index
    %63 = vector.load %arg12[%c2_52, %c0_53] : memref<8x128xf32, #tpu.memory_space<vmem>>, vector<1x128xf32>
    %cst_54 = arith.constant dense<0.000000e+00> : vector<1x128xf32>
    %64 = tpu.matmul %62, %53, %cst_54 {dimension_numbers = #tpu.dot_dimension_numbers<[1], [0], [0], [1], [0, 0, 1, 1], [], []>} : vector<1x128xf32>, vector<128x128xf32>, vector<1x128xf32> -> vector<1x128xf32>
    %65 = arith.addf %63, %64 : vector<1x128xf32>
    %66 = math.tanh %65 : vector<1x128xf32>
    %c3_55 = arith.constant 3 : index
    %c0_56 = arith.constant 0 : index
    %67 = vector.load %arg12[%c3_55, %c0_56] : memref<8x128xf32, #tpu.memory_space<vmem>>, vector<1x128xf32>
    %cst_57 = arith.constant dense<0.000000e+00> : vector<1x128xf32>
    %68 = tpu.matmul %66, %53, %cst_57 {dimension_numbers = #tpu.dot_dimension_numbers<[1], [0], [0], [1], [0, 0, 1, 1], [], []>} : vector<1x128xf32>, vector<128x128xf32>, vector<1x128xf32> -> vector<1x128xf32>
    %69 = arith.addf %67, %68 : vector<1x128xf32>
    %70 = math.tanh %69 : vector<1x128xf32>
    %c4_58 = arith.constant 4 : index
    %c0_59 = arith.constant 0 : index
    %71 = vector.load %arg12[%c4_58, %c0_59] : memref<8x128xf32, #tpu.memory_space<vmem>>, vector<1x128xf32>
    %cst_60 = arith.constant dense<0.000000e+00> : vector<1x128xf32>
    %72 = tpu.matmul %70, %53, %cst_60 {dimension_numbers = #tpu.dot_dimension_numbers<[1], [0], [0], [1], [0, 0, 1, 1], [], []>} : vector<1x128xf32>, vector<128x128xf32>, vector<1x128xf32> -> vector<1x128xf32>
    %73 = arith.addf %71, %72 : vector<1x128xf32>
    %74 = math.tanh %73 : vector<1x128xf32>
    %c5_61 = arith.constant 5 : index
    %c0_62 = arith.constant 0 : index
    %75 = vector.load %arg12[%c5_61, %c0_62] : memref<8x128xf32, #tpu.memory_space<vmem>>, vector<1x128xf32>
    %cst_63 = arith.constant dense<0.000000e+00> : vector<1x128xf32>
    %76 = tpu.matmul %74, %53, %cst_63 {dimension_numbers = #tpu.dot_dimension_numbers<[1], [0], [0], [1], [0, 0, 1, 1], [], []>} : vector<1x128xf32>, vector<128x128xf32>, vector<1x128xf32> -> vector<1x128xf32>
    %77 = arith.addf %75, %76 : vector<1x128xf32>
    %78 = math.tanh %77 : vector<1x128xf32>
    %c6_64 = arith.constant 6 : index
    %c0_65 = arith.constant 0 : index
    %79 = vector.load %arg12[%c6_64, %c0_65] : memref<8x128xf32, #tpu.memory_space<vmem>>, vector<1x128xf32>
    %cst_66 = arith.constant dense<0.000000e+00> : vector<1x128xf32>
    %80 = tpu.matmul %78, %53, %cst_66 {dimension_numbers = #tpu.dot_dimension_numbers<[1], [0], [0], [1], [0, 0, 1, 1], [], []>} : vector<1x128xf32>, vector<128x128xf32>, vector<1x128xf32> -> vector<1x128xf32>
    %81 = arith.addf %79, %80 : vector<1x128xf32>
    %82 = math.tanh %81 : vector<1x128xf32>
    %c7_67 = arith.constant 7 : index
    %c0_68 = arith.constant 0 : index
    %83 = vector.load %arg12[%c7_67, %c0_68] : memref<8x128xf32, #tpu.memory_space<vmem>>, vector<1x128xf32>
    %cst_69 = arith.constant dense<0.000000e+00> : vector<1x128xf32>
    %84 = tpu.matmul %82, %53, %cst_69 {dimension_numbers = #tpu.dot_dimension_numbers<[1], [0], [0], [1], [0, 0, 1, 1], [], []>} : vector<1x128xf32>, vector<128x128xf32>, vector<1x128xf32> -> vector<1x128xf32>
    %85 = arith.addf %83, %84 : vector<1x128xf32>
    %86 = math.tanh %85 : vector<1x128xf32>
    %87 = tpu.concatenate %58, %62, %66, %70, %74, %78, %82, %86 in 0 : vector<1x128xf32>, vector<1x128xf32>, vector<1x128xf32>, vector<1x128xf32>, vector<1x128xf32>, vector<1x128xf32>, vector<1x128xf32>, vector<1x128xf32> -> vector<8x128xf32>
    %c0_70 = arith.constant 0 : index
    %c0_71 = arith.constant 0 : index
    %88 = vector.load %arg11[%c0_70, %c0_71] : memref<8x128xf32, #tpu.memory_space<vmem>>, vector<8x128xf32>
    tpu.vector_store %arg11[%c0_70, %c0_71], %87 {strides = array<i32>} : memref<8x128xf32, #tpu.memory_space<vmem>>, vector<8x128xf32>,
    %c1_72 = arith.constant 1 : index
    %c0_73 = arith.constant 0 : index
    %89 = vector.load %arg10[%c1_72, %c0_73] : memref<2x128xf32, #tpu.memory_space<vmem>>, vector<1x128xf32>
    tpu.vector_store %arg10[%c1_72, %c0_73], %86 {strides = array<i32>} : memref<2x128xf32, #tpu.memory_space<vmem>>, vector<1x128xf32>,
    %c0_74 = arith.constant 0 : index
    %c0_75 = arith.constant 0 : index
    %90 = vector.load %arg11[%c0_74, %c0_75] : memref<8x128xf32, #tpu.memory_space<vmem>>, vector<8x128xf32>
    %c0_76 = arith.constant 0 : index
    %c0_77 = arith.constant 0 : index
    %91 = vector.load %arg7[%c0_76, %c0_77] : memref<128x128xf32, #tpu.memory_space<vmem>>, vector<128x128xf32>
    %cst_78 = arith.constant dense<0.000000e+00> : vector<8x128xf32>
    %92 = tpu.matmul %90, %91, %cst_78 {dimension_numbers = #tpu.dot_dimension_numbers<[1], [0], [0], [1], [0, 0, 1, 1], [], []>} : vector<8x128xf32>, vector<128x128xf32>, vector<8x128xf32> -> vector<8x128xf32>
    %c0_79 = arith.constant 0 : index
    %c0_80 = arith.constant 0 : index
    %93 = vector.load %arg8[%c0_79, %c0_80] : memref<1x128xf32, #tpu.memory_space<vmem>>, vector<1x128xf32>
    %94 = vector.broadcast %93 : vector<1x128xf32> to vector<8x128xf32>
    %95 = arith.addf %92, %94 : vector<8x128xf32>
    %c0_81 = arith.constant 0 : index
    %c0_82 = arith.constant 0 : index
    %96 = vector.load %arg9[%c0_81, %c0_82] : memref<8x128xf32, #tpu.memory_space<vmem>>, vector<8x128xf32>
    tpu.vector_store %arg9[%c0_81, %c0_82], %95 {strides = array<i32>} : memref<8x128xf32, #tpu.memory_space<vmem>>, vector<8x128xf32>,
    return
  }
}

</mosaic_0001>

<bundles_post_ra>
// kernel: rnn_model_forward.1
= control target key start
LH: loop header
LB: loop body
LE: loop exit
PB: predicated region body
PF: predicated region fallthrough
CT: control target
= control target key end

     0   :  { %16 = vsyncpa [#allocation5], 0  ;;  %s1403_s0 = inlined_call_operand.vmem [shape: f32[8,128], index: 0, kind: input, shape index: {}]   ;;  %s1404_s1 = inlined_call_operand.hbm [shape: f32[128,128], index: 1, kind: input, shape index: {}]   ;;  %s1405_s2 = inlined_call_operand.hbm [shape: f32[128,128], index: 2, kind: input, shape index: {}]   ;;  %s1406_s3 = inlined_call_operand.vmem [shape: f32[1,128], index: 3, kind: input, shape index: {}]   ;;  %s1407_s4 = inlined_call_operand.hbm [shape: f32[128,128], index: 4, kind: input, shape index: {}]   ;;  %s1408_s5 = inlined_call_operand.hbm [shape: f32[128,128], index: 5, kind: input, shape index: {}]   ;;  %s1409_s6 = inlined_call_operand.vmem [shape: f32[1,128], index: 6, kind: input, shape index: {}]   ;;  %s1410_s7 = inlined_call_operand.hbm [shape: f32[128,128], index: 7, kind: input, shape index: {}]   ;;  %s1411_s8 = inlined_call_operand.vmem [shape: f32[1,128], index: 8, kind: input, shape index: {}]   ;;  %s1412_s9 = inlined_call_operand.hbm [shape: f32[8,128], index: 9, kind: output, shape index: {0}]   ;;  %s1413_s10 = inlined_call_operand.hbm [shape: f32[2,128], index: 10, kind: output, shape index: {1}]  }
   0x1   :  { %17 = vsyncpa [#allocation8], 0 }
   0x2   :  { %18 = vsyncpa [#allocation11], 0 }
   0x3   :  { %19 = vsyncpa [#allocation6], 0 }
   0x4   :  { %20 = vsyncpa [#allocation15], 0  ;;  %s40_s15 = sshll.u32 %s1405_s2, 4  ;;  %s966_s16 = smov [#allocation7]   ;;  %s41_s15 = int_to_ptr.hbm [resolvable:$true] %s40_s15 }
   0x5   :  { %s42_s17 = sshll.u32 %s966_s16, 4  ;;  %s68_s20 = sshll.u32 %s1408_s5, 4  ;;  %s43_s17 = int_to_ptr.vmem [resolvable:$true] %s42_s17  ;;  %s69_s20 = int_to_ptr.hbm [resolvable:$true] %s68_s20 }
   0x6   :  { %s967_s21 = smov 128   ;;  %s968_s22 = smov 8  }
   0x7   :  { %48 = dma.hbm_to_vmem [thread:$0]  %s41_s15, 2048, %s43_s17, [#allocation8], %s967_s21, %s967_s21, %s968_s22  }
   0x8   :  { %s969_s23 = smov [#allocation10]   ;;  %s27_s27 = sshll.u32 %s1404_s1, 4  ;;  %s28_s27 = int_to_ptr.hbm [resolvable:$true] %s27_s27 }
   0x9   :  { %s70_s24 = sshll.u32 %s969_s23, 4  ;;  %s55_s29 = sshll.u32 %s1407_s4, 4  ;;  %s71_s24 = int_to_ptr.vmem [resolvable:$true] %s70_s24  ;;  %s56_s29 = int_to_ptr.hbm [resolvable:$true] %s55_s29 }
   0xa   :  { %76 = dma.hbm_to_vmem [thread:$0]  %s69_s20, 2048, %s71_s24, [#allocation11], %s967_s21, %s967_s21, %s968_s22  }
   0xb   :  { %s970_s30 = smov [#allocation4]   ;;  %s971_s5 = smov [#allocation9]  }
   0xc   :  { %s29_s11 = sshll.u32 %s970_s30, 4  ;;  %s57_s12 = sshll.u32 %s971_s5, 4  ;;  %s30_s11 = int_to_ptr.vmem [resolvable:$true] %s29_s11  ;;  %s58_s12 = int_to_ptr.vmem [resolvable:$true] %s57_s12 }
   0xd   :  { %35 = dma.hbm_to_vmem [thread:$0]  %s28_s27, 2048, %s30_s11, [#allocation5], %s967_s21, %s967_s21, %s968_s22  }
   0xe   :  { %s83_s15 = sshll.u32 %s1410_s7, 4  ;;  %s972_s1 = smov [#allocation12]   ;;  %s84_s15 = int_to_ptr.hbm [resolvable:$true] %s83_s15 }
   0xf   :  { %63 = dma.hbm_to_vmem [thread:$0]  %s56_s29, 2048, %s58_s12, [#allocation8], %s967_s21, %s967_s21, %s968_s22  }
  0x10   :  { %s85_s16 = sshll.u32 %s972_s1, 4  ;;  %s86_s16 = int_to_ptr.vmem [resolvable:$true] %s85_s16 }
  0x11   :  { %91 = dma.hbm_to_vmem [thread:$0]  %s84_s15, 2048, %s86_s16, [#allocation11], %s967_s21, %s967_s21, %s968_s22  }
  0x12   :  { %956 = dma.done.wait [#allocation5], 2048  }
  0x13   :  { %957 = vsyncadd [#allocation5], 4294965248 }
  0x14   :  { %958 = dma.done.wait [#allocation8], 4096  }
  0x15   :  { %959 = vsyncadd [#allocation8], 4294963200 }
  0x16   :  { %960 = dma.done.wait [#allocation11], 4096  }
  0x17   :  { %961 = vsyncadd [#allocation11], 4294963200  ;;  %v131_v0 = vld [vmem:[#allocation4 + $0x78] sm:$0xff]  ;;  %v130_v1 = vld [vmem:[#allocation4 + $0x70] sm:$0xff]  ;;  %v973_v33 = vmov 0.0   ;;  %vm378_vm0 = vcmask 1040384  }
  0x18   :  { %136 = vmatpush.msra.mxu0 %v131_v0  ;;  %v129_v2 = vld [vmem:[#allocation4 + $0x68] sm:$0xff]  ;;  %v1046_v3 = vld [vmem:[#allocation7 + $0x78] sm:$0xff]  ;;  %v1048_v4 = vld [vmem:[#allocation7 + $0x70] sm:$0xff]  ;;  %vm380_vm1 = vcmask 1041408   ;;  %vm382_vm2 = vcmask 1042432   ;;  %vm384_vm3 = vcmask 1043456  }
  0x19   :  { %174 = vmatpush.msra.mxu1 %v1046_v3  ;;  %v128_v5 = vld [vmem:[#allocation4 + $0x60] sm:$0xff]  ;;  %v1051_v6 = vld [vmem:[#allocation7 + $0x68] sm:$0xff]  ;;  %197 = vmatpush.msra.mxu2 %v1046_v3  ;;  %v127_v7 = vld [vmem:[#allocation4 + $0x58] sm:$0xff]  ;;  %vm386_vm4 = vcmask 1044480   ;;  %vm388_vm5 = vcmask 1045504   ;;  %vm390_vm6 = vcmask 1046528  }
  0x1a   :  { %137 = vmatpush.msra.mxu0 %v130_v1  ;;  %220 = vmatpush.msra.mxu3 %v1046_v3  ;;  %v1056_v8 = vld [vmem:[#allocation7 + $0x60] sm:$0xff]  ;;  %v126_v9 = vld [vmem:[#allocation4 + $0x50] sm:$0xff]  ;;  %v1061_v10 = vld [vmem:[#allocation7 + $0x58] sm:$0xff]  ;;  %s726_s22 = sshll.u32 %s1413_s10, 4  ;;  %s975_s25 = smov [#allocation13]   ;;  %s727_s22 = int_to_ptr.hbm [resolvable:$true] %s726_s22 }
  0x1b   :  { %175 = vmatpush.msra.mxu1 %v1048_v4  ;;  %198 = vmatpush.msra.mxu2 %v1048_v4  ;;  %v125_v11 = vld [vmem:[#allocation4 + $0x48] sm:$0xff]  ;;  %v1066_v12 = vld [vmem:[#allocation7 + $0x50] sm:$0xff]  ;;  %v124_v13 = vld [vmem:[#allocation4 + $0x40] sm:$0xff]  ;;  %s713_s26 = sshll.u32 %s975_s25, 4  ;;  %s715_s28 = sshll.u32 %s1412_s9, 4  ;;  %s714_s26 = int_to_ptr.vmem [resolvable:$true] %s713_s26  ;;  %s716_s28 = int_to_ptr.hbm [resolvable:$true] %s715_s28 }
  0x1c   :  { %138 = vmatpush.msra.mxu0 %v129_v2  ;;  %221 = vmatpush.msra.mxu3 %v1048_v4  ;;  %v1071_v14 = vld [vmem:[#allocation7 + $0x48] sm:$0xff]  ;;  %v123_v15 = vld [vmem:[#allocation4 + $0x38] sm:$0xff]  ;;  %v1076_v16 = vld [vmem:[#allocation7 + $0x40] sm:$0xff] }
  0x1d   :  { %176 = vmatpush.msra.mxu1 %v1051_v6  ;;  %199 = vmatpush.msra.mxu2 %v1051_v6  ;;  %v122_v17 = vld [vmem:[#allocation4 + $0x30] sm:$0xff]  ;;  %v1081_v18 = vld [vmem:[#allocation7 + $0x38] sm:$0xff]  ;;  %v121_v19 = vld [vmem:[#allocation4 + $0x28] sm:$0xff] }
  0x1e   :  { %139 = vmatpush.msra.mxu0 %v128_v5  ;;  %222 = vmatpush.msra.mxu3 %v1051_v6  ;;  %v1086_v20 = vld [vmem:[#allocation7 + $0x30] sm:$0xff]  ;;  %v120_v21 = vld [vmem:[#allocation4 + $0x20] sm:$0xff]  ;;  %v1091_v22 = vld [vmem:[#allocation7 + $0x28] sm:$0xff] }
  0x1f   :  { %177 = vmatpush.msra.mxu1 %v1056_v8  ;;  %200 = vmatpush.msra.mxu2 %v1056_v8  ;;  %v119_v23 = vld [vmem:[#allocation4 + $0x18] sm:$0xff]  ;;  %v1096_v24 = vld [vmem:[#allocation7 + $0x20] sm:$0xff]  ;;  %v118_v25 = vld [vmem:[#allocation4 + $0x10] sm:$0xff] }
  0x20   :  { %140 = vmatpush.msra.mxu0 %v127_v7  ;;  %223 = vmatpush.msra.mxu3 %v1056_v8  ;;  %v1101_v26 = vld [vmem:[#allocation7 + $0x18] sm:$0xff]  ;;  %v117_v27 = vld [vmem:[#allocation4 + $0x8] sm:$0xff]  ;;  %v1106_v28 = vld [vmem:[#allocation7 + $0x10] sm:$0xff] }
  0x21   :  { %178 = vmatpush.msra.mxu1 %v1061_v10  ;;  %201 = vmatpush.msra.mxu2 %v1061_v10  ;;  %v116_v29 = vld [vmem:[#allocation4] sm:$0xff]  ;;  %v1111_v30 = vld [vmem:[#allocation7 + $0x8] sm:$0xff]  ;;  %v115_v31 = vld [vmem:[%s1403_s0] sm:$0xff] }
  0x22   :  { %141 = vmatpush.msra.mxu0 %v126_v9  ;;  %224 = vmatpush.msra.mxu3 %v1061_v10  ;;  %v1119_v32 = vld [vmem:[#allocation7] sm:$0xff]  ;;  %v753_v34 = vld [vmem:[%s1406_s3] ss:$0 sm:$0xff] }
  0x23   :  { %179 = vmatpush.msra.mxu1 %v1066_v12  ;;  %202 = vmatpush.msra.mxu2 %v1066_v12  ;;  %v410_v7 = vld [vmem:[#allocation9 + $0x78] sm:$0xff] }
  0x24   :  { %142 = vmatpush.msra.mxu0 %v125_v11  ;;  %225 = vmatpush.msra.mxu3 %v1066_v12  ;;  %v1218_v9 = vld [vmem:[#allocation10 + $0x78] sm:$0xff]  ;;  %v408_v11 = vld [vmem:[#allocation9 + $0x68] sm:$0xff] }
  0x25   :  { %180 = vmatpush.msra.mxu1 %v1071_v14  ;;  %203 = vmatpush.msra.mxu2 %v1071_v14 }
  0x26   :  { %143 = vmatpush.msra.mxu0 %v124_v13  ;;  %226 = vmatpush.msra.mxu3 %v1071_v14  ;;  %v407_v13 = vld [vmem:[#allocation9 + $0x60] sm:$0xff] }
  0x27   :  { %181 = vmatpush.msra.mxu1 %v1076_v16  ;;  %204 = vmatpush.msra.mxu2 %v1076_v16 }
  0x28   :  { %144 = vmatpush.msra.mxu0 %v123_v15  ;;  %227 = vmatpush.msra.mxu3 %v1076_v16  ;;  %v406_v15 = vld [vmem:[#allocation9 + $0x58] sm:$0xff] }
  0x29   :  { %182 = vmatpush.msra.mxu1 %v1081_v18  ;;  %205 = vmatpush.msra.mxu2 %v1081_v18 }
  0x2a   :  { %145 = vmatpush.msra.mxu0 %v122_v17  ;;  %228 = vmatpush.msra.mxu3 %v1081_v18  ;;  %v405_v17 = vld [vmem:[#allocation9 + $0x50] sm:$0xff] }
  0x2b   :  { %183 = vmatpush.msra.mxu1 %v1086_v20  ;;  %206 = vmatpush.msra.mxu2 %v1086_v20 }
  0x2c   :  { %146 = vmatpush.msra.mxu0 %v121_v19  ;;  %229 = vmatpush.msra.mxu3 %v1086_v20  ;;  %v404_v19 = vld [vmem:[#allocation9 + $0x48] sm:$0xff] }
  0x2d   :  { %184 = vmatpush.msra.mxu1 %v1091_v22  ;;  %207 = vmatpush.msra.mxu2 %v1091_v22 }
  0x2e   :  { %147 = vmatpush.msra.mxu0 %v120_v21  ;;  %230 = vmatpush.msra.mxu3 %v1091_v22  ;;  %v403_v21 = vld [vmem:[#allocation9 + $0x40] sm:$0xff] }
  0x2f   :  { %185 = vmatpush.msra.mxu1 %v1096_v24  ;;  %208 = vmatpush.msra.mxu2 %v1096_v24 }
  0x30   :  { %148 = vmatpush.msra.mxu0 %v119_v23  ;;  %231 = vmatpush.msra.mxu3 %v1096_v24 }
  0x31   :  { %186 = vmatpush.msra.mxu1 %v1101_v26  ;;  %209 = vmatpush.msra.mxu2 %v1101_v26 }
  0x32   :  { %149 = vmatpush.msra.mxu0 %v118_v25  ;;  %232 = vmatpush.msra.mxu3 %v1101_v26 }
  0x33   :  { %187 = vmatpush.msra.mxu1 %v1106_v28  ;;  %210 = vmatpush.msra.mxu2 %v1106_v28 }
  0x34   :  { %150 = vmatpush.msra.mxu0 %v117_v27  ;;  %233 = vmatpush.msra.mxu3 %v1106_v28 }
  0x35   :  { %188 = vmatpush.msra.mxu1 %v1111_v30  ;;  %211 = vmatpush.msra.mxu2 %v1111_v30 }
  0x36   :  { %151 = vmatpush.msra.mxu0 %v116_v29  ;;  %234 = vmatpush.msra.mxu3 %v1111_v30  ;;  %v401_v29 = vld [vmem:[#allocation9 + $0x30] sm:$0xff] }
  0x37   :  { %152 = vmatmul.f32.vlgmr.msra.gmra.mxu0 %v115_v31  ;;  %189 = vmatpush.msra.mxu1 %v1119_v32  ;;  %v400_v31 = vld [vmem:[#allocation9 + $0x28] sm:$0xff] }
  0x38   :  { %190 = vmatmul.f32.vlgmr.msra.gmra.mxu1 %v973_v33  ;;  %212 = vmatpush.msra.mxu2 %v1119_v32 }
  0x39   :  { %235 = vmatpush.msra.mxu3 %v1119_v32  ;;  %243 = vmatpush.msrb.mxu0 %v1046_v3 }
  0x3a   :  { %266 = vmatpush.msrb.mxu1 %v1046_v3  ;;  %289 = vmatpush.msrb.mxu2 %v1046_v3 }
  0x3b   :  { %244 = vmatpush.msrb.mxu0 %v1048_v4  ;;  %312 = vmatpush.msrb.mxu3 %v1046_v3 }
  0x3c   :  { %267 = vmatpush.msrb.mxu1 %v1048_v4  ;;  %290 = vmatpush.msrb.mxu2 %v1048_v4 }
  0x3d   :  { %245 = vmatpush.msrb.mxu0 %v1051_v6  ;;  %313 = vmatpush.msrb.mxu3 %v1048_v4 }
  0x3e   :  { %268 = vmatpush.msrb.mxu1 %v1051_v6  ;;  %291 = vmatpush.msrb.mxu2 %v1051_v6 }
  0x3f   :  { %246 = vmatpush.msrb.mxu0 %v1056_v8  ;;  %314 = vmatpush.msrb.mxu3 %v1051_v6 }
  0x40   :  { %269 = vmatpush.msrb.mxu1 %v1056_v8  ;;  %292 = vmatpush.msrb.mxu2 %v1056_v8 }
  0x41   :  { %247 = vmatpush.msrb.mxu0 %v1061_v10  ;;  %315 = vmatpush.msrb.mxu3 %v1056_v8 }
  0x42   :  { %270 = vmatpush.msrb.mxu1 %v1061_v10  ;;  %293 = vmatpush.msrb.mxu2 %v1061_v10 }
  0x43   :  { %248 = vmatpush.msrb.mxu0 %v1066_v12  ;;  %316 = vmatpush.msrb.mxu3 %v1061_v10 }
  0x44   :  { %271 = vmatpush.msrb.mxu1 %v1066_v12  ;;  %294 = vmatpush.msrb.mxu2 %v1066_v12 }
  0x45   :  { %249 = vmatpush.msrb.mxu0 %v1071_v14  ;;  %317 = vmatpush.msrb.mxu3 %v1066_v12 }
  0x46   :  { %272 = vmatpush.msrb.mxu1 %v1071_v14  ;;  %295 = vmatpush.msrb.mxu2 %v1071_v14 }
  0x47   :  { %250 = vmatpush.msrb.mxu0 %v1076_v16  ;;  %318 = vmatpush.msrb.mxu3 %v1071_v14 }
  0x48   :  { %273 = vmatpush.msrb.mxu1 %v1076_v16  ;;  %296 = vmatpush.msrb.mxu2 %v1076_v16 }
  0x49   :  { %251 = vmatpush.msrb.mxu0 %v1081_v18  ;;  %319 = vmatpush.msrb.mxu3 %v1076_v16 }
  0x4a   :  { %274 = vmatpush.msrb.mxu1 %v1081_v18  ;;  %297 = vmatpush.msrb.mxu2 %v1081_v18 }
  0x4b   :  { %252 = vmatpush.msrb.mxu0 %v1086_v20  ;;  %320 = vmatpush.msrb.mxu3 %v1081_v18 }
  0x4c   :  { %275 = vmatpush.msrb.mxu1 %v1086_v20  ;;  %298 = vmatpush.msrb.mxu2 %v1086_v20 }
  0x4d   :  { %253 = vmatpush.msrb.mxu0 %v1091_v22  ;;  %321 = vmatpush.msrb.mxu3 %v1086_v20 }
  0x4e   :  { %276 = vmatpush.msrb.mxu1 %v1091_v22  ;;  %299 = vmatpush.msrb.mxu2 %v1091_v22 }
  0x4f   :  { %254 = vmatpush.msrb.mxu0 %v1096_v24  ;;  %322 = vmatpush.msrb.mxu3 %v1091_v22 }
  0x50   :  { %277 = vmatpush.msrb.mxu1 %v1096_v24  ;;  %300 = vmatpush.msrb.mxu2 %v1096_v24 }
  0x51   :  { %255 = vmatpush.msrb.mxu0 %v1101_v26  ;;  %323 = vmatpush.msrb.mxu3 %v1096_v24 }
  0x52   :  { %278 = vmatpush.msrb.mxu1 %v1101_v26  ;;  %301 = vmatpush.msrb.mxu2 %v1101_v26 }
  0x53   :  { %256 = vmatpush.msrb.mxu0 %v1106_v28  ;;  %324 = vmatpush.msrb.mxu3 %v1101_v26 }
  0x54   :  { %279 = vmatpush.msrb.mxu1 %v1106_v28  ;;  %302 = vmatpush.msrb.mxu2 %v1106_v28 }
  0x55   :  { %257 = vmatpush.msrb.mxu0 %v1111_v30  ;;  %325 = vmatpush.msrb.mxu3 %v1106_v28 }
  0x56   :  { %280 = vmatpush.msrb.mxu1 %v1111_v30  ;;  %303 = vmatpush.msrb.mxu2 %v1111_v30 }
  0x57   :  { %258 = vmatpush.msrb.mxu0 %v1119_v32  ;;  %326 = vmatpush.msrb.mxu3 %v1111_v30 }
  0x58   :  { %281 = vmatpush.msrb.mxu1 %v1119_v32  ;;  %304 = vmatpush.msrb.mxu2 %v1119_v32 }
  0x59   :  { %327 = vmatpush.msrb.mxu3 %v1119_v32  ;;  %335 = vmatpush.msra.mxu0 %v1046_v3 }
  0x5a   :  { %415 = vmatpush.msra.mxu1 %v410_v7 }
  0x5b   :  { %336 = vmatpush.msra.mxu0 %v1048_v4 }
  0x5d   :  { %337 = vmatpush.msra.mxu0 %v1051_v6 }
  0x5f   :  { %338 = vmatpush.msra.mxu0 %v1056_v8  ;;  %v409_v8 = vld [vmem:[#allocation9 + $0x70] sm:$0xff] }
  0x60   :  { %416 = vmatpush.msra.mxu1 %v409_v8 }
  0x61   :  { %339 = vmatpush.msra.mxu0 %v1061_v10  ;;  %v1220_v10 = vld [vmem:[#allocation10 + $0x70] sm:$0xff] }
  0x62   :  { %417 = vmatpush.msra.mxu1 %v408_v11 }
  0x63   :  { %340 = vmatpush.msra.mxu0 %v1066_v12  ;;  %v1224_v12 = vld [vmem:[#allocation10 + $0x68] sm:$0xff] }
  0x64   :  { %418 = vmatpush.msra.mxu1 %v407_v13 }
  0x65   :  { %341 = vmatpush.msra.mxu0 %v1071_v14  ;;  %v1229_v14 = vld [vmem:[#allocation10 + $0x60] sm:$0xff] }
  0x66   :  { %419 = vmatpush.msra.mxu1 %v406_v15 }
  0x67   :  { %342 = vmatpush.msra.mxu0 %v1076_v16  ;;  %v1234_v16 = vld [vmem:[#allocation10 + $0x58] sm:$0xff] }
  0x68   :  { %420 = vmatpush.msra.mxu1 %v405_v17 }
  0x69   :  { %343 = vmatpush.msra.mxu0 %v1081_v18  ;;  %v1239_v18 = vld [vmem:[#allocation10 + $0x50] sm:$0xff] }
  0x6a   :  { %421 = vmatpush.msra.mxu1 %v404_v19 }
  0x6b   :  { %344 = vmatpush.msra.mxu0 %v1086_v20  ;;  %v1244_v20 = vld [vmem:[#allocation10 + $0x48] sm:$0xff] }
  0x6c   :  { %422 = vmatpush.msra.mxu1 %v403_v21 }
  0x6d   :  { %345 = vmatpush.msra.mxu0 %v1091_v22  ;;  %v402_v22 = vld [vmem:[#allocation9 + $0x38] sm:$0xff] }
  0x6e   :  { %423 = vmatpush.msra.mxu1 %v402_v22 }
  0x6f   :  { %346 = vmatpush.msra.mxu0 %v1096_v24 }
  0x70   :  { %424 = vmatpush.msra.mxu1 %v401_v29  ;;  %v677_v29 = vld [vmem:[#allocation12 + $0x50] sm:$0xff] }
  0x71   :  { %347 = vmatpush.msra.mxu0 %v1101_v26 }
  0x72   :  { %425 = vmatpush.msra.mxu1 %v400_v31  ;;  %v675_v31 = vld [vmem:[#allocation12 + $0x40] sm:$0xff] }
  0x73   :  { %348 = vmatpush.msra.mxu0 %v1106_v28 }
  0x75   :  { %349 = vmatpush.msra.mxu0 %v1111_v30  ;;  %v1256_v30 = vld [vmem:[#allocation10 + $0x40] sm:$0xff] }
  0x77   :  { %350 = vmatpush.msra.mxu0 %v1119_v32  ;;  %v1259_v32 = vld [vmem:[#allocation10 + $0x38] sm:$0xff] }
  0xb4   :  { %v153_v35 = vpop.f32.mrf.mxu0 }
  0xb5   :  { %v154_v36 = vadd.f32 %v753_v34, %v153_v35  ;;  %v191_v37 = vpop.f32.mrf.mxu1  ;;  %v399_v34 = vld [vmem:[#allocation9 + $0x20] sm:$0xff]  ;;  %v1264_v35 = vld [vmem:[#allocation10 + $0x30] sm:$0xff] }
  0xb6   :  { %426 = vmatpush.msra.mxu1 %v399_v34 }
  0xb7   :  { %156 = vst [vmem:[#allocation3] sm:$0xff] %v154_v36  ;;  %v398_v36 = vld [vmem:[#allocation9 + $0x18] sm:$0xff] }
  0xb8   :  { %427 = vmatpush.msra.mxu1 %v398_v36 }
  0xbe   :  { %v173_v38 = vld [vmem:[#allocation3] sm:$0x1]  ;;  %v196_v41 = vld [vmem:[#allocation3 + $0x1] sm:$0x1]  ;;  %v219_v45 = vld [vmem:[#allocation3 + $0x2] sm:$0x1] }
  0xbf   :  { %v194_v39 = vadd.f32 %v191_v37, %v173_v38  ;;  %v242_v53 = vld [vmem:[#allocation3 + $0x3] sm:$0x1]  ;;  %v265_v59 = vld [vmem:[#allocation3 + $0x4] sm:$0x1]  ;;  %v288_v1 = vld [vmem:[#allocation3 + $0x5] sm:$0x1] }
  0xc0   :  { %v311_v23 = vld [vmem:[#allocation3 + $0x6] sm:$0x1]  ;;  %v1269_v37 = vld [vmem:[#allocation10 + $0x28] sm:$0xff]  ;;  %v397_v38 = vld [vmem:[#allocation9 + $0x10] sm:$0xff] }
  0xc1   :  { %756 = vtanh.f32 %v194_v39  ;;  %v1274_v39 = vld [vmem:[#allocation10 + $0x20] sm:$0xff]  ;;  %428 = vmatpush.msra.mxu1 %v397_v38 }
  0xc7   :  { %v757_v40 = vpop.eup %756 }
  0xc8   :  { %213 = vmatmul.f32.vlgmr.msra.gmra.mxu2 %v757_v40 }
  0xc9   :  { %453 = vmatpush.msra.mxu2 %v1218_v9 }
  0xcb   :  { %454 = vmatpush.msra.mxu2 %v1220_v10 }
  0xcd   :  { %455 = vmatpush.msra.mxu2 %v1224_v12 }
  0xcf   :  { %456 = vmatpush.msra.mxu2 %v1229_v14 }
  0xd1   :  { %457 = vmatpush.msra.mxu2 %v1234_v16 }
  0xd3   :  { %458 = vmatpush.msra.mxu2 %v1239_v18 }
  0xd5   :  { %459 = vmatpush.msra.mxu2 %v1244_v20 }
  0xd7   :  { %460 = vmatpush.msra.mxu2 %v1256_v30 }
  0xd9   :  { %461 = vmatpush.msra.mxu2 %v1259_v32 }
  0xdb   :  { %462 = vmatpush.msra.mxu2 %v1264_v35 }
  0xdd   :  { %463 = vmatpush.msra.mxu2 %v1269_v37 }
  0xdf   :  { %464 = vmatpush.msra.mxu2 %v1274_v39 }
 0x14b   :  { %v214_v42 = vpop.f32.mrf.mxu2 }
 0x14c   :  { %v217_v43 = vadd.f32 %v214_v42, %v196_v41  ;;  %v1279_v41 = vld [vmem:[#allocation10 + $0x18] sm:$0xff]  ;;  %v395_v42 = vld [vmem:[#allocation9] sm:$0xff] }
 0x14d   :  { %465 = vmatpush.msra.mxu2 %v1279_v41 }
 0x14e   :  { %758 = vtanh.f32 %v217_v43  ;;  %v1281_v43 = vld [vmem:[#allocation10 + $0x10] sm:$0xff] }
 0x14f   :  { %466 = vmatpush.msra.mxu2 %v1281_v43 }
 0x154   :  { %v759_v44 = vpop.eup %758 }
 0x155   :  { %236 = vmatmul.f32.vlgmr.msra.gmra.mxu3 %v759_v44  ;;  %v358_v48 = vrot.slane %v759_v44, 7  ;;  %v1286_v44 = vld [vmem:[#allocation10 + $0x8] sm:$0xff] }
 0x156   :  { %476 = vmatpush.msra.mxu3 %v1218_v9  ;;  %467 = vmatpush.msra.mxu2 %v1286_v44 }
 0x157   :  { %v379_v51 = vsel %vm378_vm0, %v757_v40, %v358_v48  ;;  %v396_v40 = vld [vmem:[#allocation9 + $0x8] sm:$0xff] }
 0x158   :  { %477 = vmatpush.msra.mxu3 %v1220_v10  ;;  %429 = vmatpush.msra.mxu1 %v396_v40  ;;  %v673_v40 = vld [vmem:[#allocation12 + $0x30] sm:$0xff] }
 0x15a   :  { %478 = vmatpush.msra.mxu3 %v1224_v12  ;;  %430 = vmatpush.msra.mxu1 %v395_v42  ;;  %v671_v42 = vld [vmem:[#allocation12 + $0x20] sm:$0xff] }
 0x15c   :  { %479 = vmatpush.msra.mxu3 %v1229_v14 }
 0x15e   :  { %480 = vmatpush.msra.mxu3 %v1234_v16 }
 0x160   :  { %481 = vmatpush.msra.mxu3 %v1239_v18 }
 0x162   :  { %482 = vmatpush.msra.mxu3 %v1244_v20 }
 0x164   :  { %483 = vmatpush.msra.mxu3 %v1256_v30 }
 0x166   :  { %484 = vmatpush.msra.mxu3 %v1259_v32 }
 0x168   :  { %485 = vmatpush.msra.mxu3 %v1264_v35 }
 0x16a   :  { %486 = vmatpush.msra.mxu3 %v1269_v37 }
 0x16c   :  { %487 = vmatpush.msra.mxu3 %v1274_v39 }
 0x16e   :  { %488 = vmatpush.msra.mxu3 %v1279_v41 }
 0x170   :  { %489 = vmatpush.msra.mxu3 %v1281_v43 }
 0x172   :  { %490 = vmatpush.msra.mxu3 %v1286_v44 }
 0x1d8   :  { %v237_v46 = vpop.f32.mrf.mxu3 }
 0x1d9   :  { %v240_v47 = vadd.f32 %v237_v46, %v219_v45  ;;  %v1291_v45 = vld [vmem:[#allocation10] sm:$0xff] }
 0x1da   :  { %468 = vmatpush.msra.mxu2 %v1291_v45  ;;  %491 = vmatpush.msra.mxu3 %v1291_v45 }
 0x1db   :  { %760 = vtanh.f32 %v240_v47 }
 0x1e1   :  { %v761_v49 = vpop.eup %760 }
 0x1e2   :  { %v361_v50 = vrot.slane %v761_v49, 6  ;;  %259 = vmatmul.f32.vlgmr.msrb.gmra.mxu0 %v761_v49 }
 0x1e3   :  { %499 = vmatpush.msrb.mxu0 %v1218_v9 }
 0x1e4   :  { %v381_v52 = vsel %vm380_vm1, %v379_v51, %v361_v50  ;;  %v754_v51 = vld [vmem:[%s1409_s6] ss:$0 sm:$0xff]  ;;  %s974_s6 = smov [#allocation14]  }
 0x1e5   :  { %500 = vmatpush.msrb.mxu0 %v1220_v10  ;;  %s724_s19 = sshll.u32 %s974_s6, 4  ;;  %s725_s19 = int_to_ptr.vmem [resolvable:$true] %s724_s19 }
 0x1e7   :  { %501 = vmatpush.msrb.mxu0 %v1224_v12 }
 0x1e9   :  { %502 = vmatpush.msrb.mxu0 %v1229_v14 }
 0x1eb   :  { %503 = vmatpush.msrb.mxu0 %v1234_v16 }
 0x1ed   :  { %504 = vmatpush.msrb.mxu0 %v1239_v18 }
 0x1ef   :  { %505 = vmatpush.msrb.mxu0 %v1244_v20 }
 0x1f1   :  { %506 = vmatpush.msrb.mxu0 %v1256_v30 }
 0x1f3   :  { %507 = vmatpush.msrb.mxu0 %v1259_v32 }
 0x1f5   :  { %508 = vmatpush.msrb.mxu0 %v1264_v35 }
 0x1f7   :  { %509 = vmatpush.msrb.mxu0 %v1269_v37 }
 0x1f9   :  { %510 = vmatpush.msrb.mxu0 %v1274_v39 }
 0x1fb   :  { %511 = vmatpush.msrb.mxu0 %v1279_v41 }
 0x1fd   :  { %512 = vmatpush.msrb.mxu0 %v1281_v43 }
 0x1ff   :  { %513 = vmatpush.msrb.mxu0 %v1286_v44 }
 0x201   :  { %514 = vmatpush.msrb.mxu0 %v1291_v45 }
 0x25f   :  { %v260_v54 = vpop.f32.mrf.mxu0 }
 0x260   :  { %v263_v55 = vadd.f32 %v260_v54, %v242_v53 }
 0x262   :  { %762 = vtanh.f32 %v263_v55 }
 0x268   :  { %v763_v56 = vpop.eup %762 }
 0x269   :  { %v364_v57 = vrot.slane %v763_v56, 5  ;;  %282 = vmatmul.f32.vlgmr.msrb.gmra.mxu1 %v763_v56 }
 0x26a   :  { %522 = vmatpush.msrb.mxu1 %v1218_v9 }
 0x26b   :  { %v383_v58 = vsel %vm382_vm2, %v381_v52, %v364_v57 }
 0x26c   :  { %523 = vmatpush.msrb.mxu1 %v1220_v10 }
 0x26e   :  { %524 = vmatpush.msrb.mxu1 %v1224_v12 }
 0x270   :  { %525 = vmatpush.msrb.mxu1 %v1229_v14 }
 0x272   :  { %526 = vmatpush.msrb.mxu1 %v1234_v16 }
 0x274   :  { %527 = vmatpush.msrb.mxu1 %v1239_v18 }
 0x276   :  { %528 = vmatpush.msrb.mxu1 %v1244_v20 }
 0x278   :  { %529 = vmatpush.msrb.mxu1 %v1256_v30 }
 0x27a   :  { %530 = vmatpush.msrb.mxu1 %v1259_v32 }
 0x27c   :  { %531 = vmatpush.msrb.mxu1 %v1264_v35 }
 0x27e   :  { %532 = vmatpush.msrb.mxu1 %v1269_v37 }
 0x280   :  { %533 = vmatpush.msrb.mxu1 %v1274_v39 }
 0x282   :  { %534 = vmatpush.msrb.mxu1 %v1279_v41 }
 0x284   :  { %535 = vmatpush.msrb.mxu1 %v1281_v43 }
 0x286   :  { %536 = vmatpush.msrb.mxu1 %v1286_v44 }
 0x288   :  { %537 = vmatpush.msrb.mxu1 %v1291_v45 }
 0x2e6   :  { %v283_v60 = vpop.f32.mrf.mxu1 }
 0x2e7   :  { %v286_v61 = vadd.f32 %v283_v60, %v265_v59 }
 0x2e9   :  { %764 = vtanh.f32 %v286_v61 }
 0x2ef   :  { %v765_v62 = vpop.eup %764 }
 0x2f0   :  { %v367_v63 = vrot.slane %v765_v62, 4  ;;  %305 = vmatmul.f32.vlgmr.msrb.gmra.mxu2 %v765_v62 }
 0x2f1   :  { %545 = vmatpush.msrb.mxu2 %v1218_v9 }
 0x2f2   :  { %v385_v0 = vsel %vm384_vm3, %v383_v58, %v367_v63 }
 0x2f3   :  { %546 = vmatpush.msrb.mxu2 %v1220_v10 }
 0x2f5   :  { %547 = vmatpush.msrb.mxu2 %v1224_v12 }
 0x2f7   :  { %548 = vmatpush.msrb.mxu2 %v1229_v14 }
 0x2f8   :  { %469 = vmatmul.f32.vlgmr.msra.gmra.mxu2 %v973_v33  ;;  %v334_v33 = vld [vmem:[#allocation3 + $0x7] sm:$0x1] }
 0x2f9   :  { %549 = vmatpush.msrb.mxu2 %v1234_v16 }
 0x2fb   :  { %550 = vmatpush.msrb.mxu2 %v1239_v18 }
 0x2fd   :  { %551 = vmatpush.msrb.mxu2 %v1244_v20 }
 0x2ff   :  { %552 = vmatpush.msrb.mxu2 %v1256_v30 }
 0x301   :  { %553 = vmatpush.msrb.mxu2 %v1259_v32 }
 0x303   :  { %554 = vmatpush.msrb.mxu2 %v1264_v35 }
 0x305   :  { %555 = vmatpush.msrb.mxu2 %v1269_v37 }
 0x307   :  { %556 = vmatpush.msrb.mxu2 %v1274_v39 }
 0x309   :  { %557 = vmatpush.msrb.mxu2 %v1279_v41 }
 0x30b   :  { %558 = vmatpush.msrb.mxu2 %v1281_v43 }
 0x30d   :  { %559 = vmatpush.msrb.mxu2 %v1286_v44 }
 0x30f   :  { %560 = vmatpush.msrb.mxu2 %v1291_v45 }
 0x373   :  { %v306_v2 = vpop.f32.mrf.mxu2 }
 0x374   :  { %v309_v3 = vadd.f32 %v306_v2, %v288_v1 }
 0x376   :  { %766 = vtanh.f32 %v309_v3 }
 0x37b   :  { %v470_v54 = vpop.f32.mrf.mxu2 }
 0x37c   :  { %v767_v4 = vpop.eup %766 }
 0x37d   :  { %v370_v5 = vrot.slane %v767_v4, 3  ;;  %328 = vmatmul.f32.vlgmr.msrb.gmra.mxu3 %v767_v4 }
 0x37e   :  { %568 = vmatpush.msrb.mxu3 %v1218_v9 }
 0x37f   :  { %v387_v6 = vsel %vm386_vm4, %v385_v0, %v370_v5 }
 0x380   :  { %569 = vmatpush.msrb.mxu3 %v1220_v10 }
 0x382   :  { %570 = vmatpush.msrb.mxu3 %v1224_v12 }
 0x384   :  { %571 = vmatpush.msrb.mxu3 %v1229_v14 }
 0x386   :  { %572 = vmatpush.msrb.mxu3 %v1234_v16 }
 0x388   :  { %573 = vmatpush.msrb.mxu3 %v1239_v18 }
 0x38a   :  { %574 = vmatpush.msrb.mxu3 %v1244_v20 }
 0x38c   :  { %575 = vmatpush.msrb.mxu3 %v1256_v30 }
 0x38e   :  { %576 = vmatpush.msrb.mxu3 %v1259_v32 }
 0x390   :  { %577 = vmatpush.msrb.mxu3 %v1264_v35 }
 0x392   :  { %578 = vmatpush.msrb.mxu3 %v1269_v37 }
 0x394   :  { %579 = vmatpush.msrb.mxu3 %v1274_v39 }
 0x396   :  { %580 = vmatpush.msrb.mxu3 %v1279_v41 }
 0x398   :  { %581 = vmatpush.msrb.mxu3 %v1281_v43 }
 0x39a   :  { %582 = vmatpush.msrb.mxu3 %v1286_v44 }
 0x39c   :  { %583 = vmatpush.msrb.mxu3 %v1291_v45 }
 0x400   :  { %v329_v24 = vpop.f32.mrf.mxu3 }
 0x401   :  { %v332_v25 = vadd.f32 %v329_v24, %v311_v23  ;;  %v682_v24 = vld [vmem:[#allocation12 + $0x78] sm:$0xff] }
 0x402   :  { %687 = vmatpush.msra.mxu2 %v682_v24 }
 0x403   :  { %768 = vtanh.f32 %v332_v25  ;;  %v681_v25 = vld [vmem:[#allocation12 + $0x70] sm:$0xff] }
 0x404   :  { %688 = vmatpush.msra.mxu2 %v681_v25 }
 0x409   :  { %v769_v26 = vpop.eup %768 }
 0x40a   :  { %v373_v27 = vrot.slane %v769_v26, 2  ;;  %351 = vmatmul.f32.vlgmr.msra.gmra.mxu0 %v769_v26  ;;  %v680_v26 = vld [vmem:[#allocation12 + $0x68] sm:$0xff] }
 0x40b   :  { %591 = vmatpush.msra.mxu0 %v1218_v9  ;;  %689 = vmatpush.msra.mxu2 %v680_v26 }
 0x40c   :  { %v1254_v28 = vsel %vm388_vm5, %v387_v6, %v373_v27  ;;  %v679_v27 = vld [vmem:[#allocation12 + $0x60] sm:$0xff] }
 0x40d   :  { %592 = vmatpush.msra.mxu0 %v1220_v10  ;;  %690 = vmatpush.msra.mxu2 %v679_v27 }
 0x40f   :  { %593 = vmatpush.msra.mxu0 %v1224_v12 }
 0x411   :  { %594 = vmatpush.msra.mxu0 %v1229_v14 }
 0x413   :  { %595 = vmatpush.msra.mxu0 %v1234_v16 }
 0x415   :  { %596 = vmatpush.msra.mxu0 %v1239_v18 }
 0x417   :  { %597 = vmatpush.msra.mxu0 %v1244_v20 }
 0x419   :  { %598 = vmatpush.msra.mxu0 %v1256_v30 }
 0x41b   :  { %599 = vmatpush.msra.mxu0 %v1259_v32 }
 0x41d   :  { %600 = vmatpush.msra.mxu0 %v1264_v35 }
 0x41f   :  { %601 = vmatpush.msra.mxu0 %v1269_v37 }
 0x421   :  { %602 = vmatpush.msra.mxu0 %v1274_v39 }
 0x423   :  { %603 = vmatpush.msra.mxu0 %v1279_v41 }
 0x425   :  { %604 = vmatpush.msra.mxu0 %v1281_v43 }
 0x427   :  { %605 = vmatpush.msra.mxu0 %v1286_v44 }
 0x429   :  { %606 = vmatpush.msra.mxu0 %v1291_v45 }
 0x487   :  { %v352_v46 = vpop.f32.mrf.mxu0 }
 0x488   :  { %v355_v47 = vadd.f32 %v352_v46, %v334_v33  ;;  %v667_v33 = vld [vmem:[#allocation12] sm:$0xff] }
 0x48a   :  { %770 = vtanh.f32 %v355_v47 }
 0x490   :  { %v771_v48 = vpop.eup %770 }
 0x491   :  { %393 = vst [vmem:[#allocation14] sm:$0x1] %v771_v48  ;;  %v376_v49 = vrot.slane %v771_v48, 1 }
 0x493   :  { %v391_v50 = vsel %vm390_vm6, %v1254_v28, %v376_v49  ;;  %v678_v28 = vld [vmem:[#allocation12 + $0x58] sm:$0xff] }
 0x494   :  { %431 = vmatmul.f32.vlgmr.msra.gmra.mxu1 %v391_v50  ;;  %691 = vmatpush.msra.mxu2 %v678_v28 }
 0x495   :  { %614 = vmatpush.msra.mxu1 %v1218_v9 }
 0x496   :  { %692 = vmatpush.msra.mxu2 %v677_v29 }
 0x497   :  { %615 = vmatpush.msra.mxu1 %v1220_v10 }
 0x499   :  { %616 = vmatpush.msra.mxu1 %v1224_v12 }
 0x49b   :  { %617 = vmatpush.msra.mxu1 %v1229_v14 }
 0x49d   :  { %618 = vmatpush.msra.mxu1 %v1234_v16 }
 0x49f   :  { %619 = vmatpush.msra.mxu1 %v1239_v18 }
 0x4a1   :  { %620 = vmatpush.msra.mxu1 %v1244_v20 }
 0x4a3   :  { %621 = vmatpush.msra.mxu1 %v1256_v30  ;;  %v676_v30 = vld [vmem:[#allocation12 + $0x48] sm:$0xff] }
 0x4a4   :  { %693 = vmatpush.msra.mxu2 %v676_v30 }
 0x4a5   :  { %622 = vmatpush.msra.mxu1 %v1259_v32  ;;  %v674_v32 = vld [vmem:[#allocation12 + $0x38] sm:$0xff] }
 0x4a6   :  { %694 = vmatpush.msra.mxu2 %v675_v31 }
 0x4a7   :  { %623 = vmatpush.msra.mxu1 %v1264_v35 }
 0x4a8   :  { %695 = vmatpush.msra.mxu2 %v674_v32 }
 0x4a9   :  { %624 = vmatpush.msra.mxu1 %v1269_v37 }
 0x4aa   :  { %696 = vmatpush.msra.mxu2 %v673_v40 }
 0x4ab   :  { %625 = vmatpush.msra.mxu1 %v1274_v39 }
 0x4ad   :  { %626 = vmatpush.msra.mxu1 %v1279_v41  ;;  %v672_v41 = vld [vmem:[#allocation12 + $0x28] sm:$0xff] }
 0x4ae   :  { %697 = vmatpush.msra.mxu2 %v672_v41 }
 0x4af   :  { %627 = vmatpush.msra.mxu1 %v1281_v43  ;;  %v670_v43 = vld [vmem:[#allocation12 + $0x18] sm:$0xff] }
 0x4b0   :  { %698 = vmatpush.msra.mxu2 %v671_v42 }
 0x4b1   :  { %628 = vmatpush.msra.mxu1 %v1286_v44  ;;  %v669_v44 = vld [vmem:[#allocation12 + $0x10] sm:$0xff] }
 0x4b2   :  { %699 = vmatpush.msra.mxu2 %v670_v43 }
 0x4b3   :  { %629 = vmatpush.msra.mxu1 %v1291_v45  ;;  %v668_v45 = vld [vmem:[#allocation12 + $0x8] sm:$0xff] }
 0x4b4   :  { %700 = vmatpush.msra.mxu2 %v669_v44 }
 0x4b6   :  { %701 = vmatpush.msra.mxu2 %v668_v45 }
 0x4b8   :  { %702 = vmatpush.msra.mxu2 %v667_v33 }
 0x511   :  { %v432_v52 = vpop.f32.mrf.mxu1 }
 0x512   :  { %v433_v53 = vadd.f32 %v754_v51, %v432_v52  ;;  %v755_v52 = vld [vmem:[%s1411_s8] ss:$0 sm:$0xff] }
 0x514   :  { %435 = vst [vmem:[#allocation3] sm:$0xff] %v433_v53 }
 0x51b   :  { %v452_v55 = vld [vmem:[#allocation3] sm:$0x1]  ;;  %v475_v58 = vld [vmem:[#allocation3 + $0x1] sm:$0x1]  ;;  %v498_v62 = vld [vmem:[#allocation3 + $0x2] sm:$0x1] }
 0x51c   :  { %v473_v56 = vadd.f32 %v470_v54, %v452_v55  ;;  %v521_v6 = vld [vmem:[#allocation3 + $0x3] sm:$0x1]  ;;  %v544_v12 = vld [vmem:[#allocation3 + $0x4] sm:$0x1]  ;;  %v567_v18 = vld [vmem:[#allocation3 + $0x5] sm:$0x1] }
 0x51d   :  { %v590_v34 = vld [vmem:[#allocation3 + $0x6] sm:$0x1]  ;;  %v613_v46 = vld [vmem:[#allocation3 + $0x7] sm:$0x1] }
 0x51e   :  { %772 = vtanh.f32 %v473_v56 }
 0x524   :  { %v773_v57 = vpop.eup %772 }
 0x525   :  { %492 = vmatmul.f32.vlgmr.msra.gmra.mxu3 %v773_v57 }
 0x5a8   :  { %v493_v59 = vpop.f32.mrf.mxu3 }
 0x5a9   :  { %v496_v60 = vadd.f32 %v493_v59, %v475_v58 }
 0x5ab   :  { %774 = vtanh.f32 %v496_v60 }
 0x5b1   :  { %v775_v61 = vpop.eup %774 }
 0x5b2   :  { %515 = vmatmul.f32.vlgmr.msrb.gmra.mxu0 %v775_v61  ;;  %v637_v1 = vrot.slane %v775_v61, 7 }
 0x5b4   :  { %v657_v4 = vsel %vm378_vm0, %v773_v57, %v637_v1 }
 0x62f   :  { %v516_v63 = vpop.f32.mrf.mxu0 }
 0x630   :  { %v519_v0 = vadd.f32 %v516_v63, %v498_v62 }
 0x632   :  { %776 = vtanh.f32 %v519_v0 }
 0x638   :  { %v777_v2 = vpop.eup %776 }
 0x639   :  { %v640_v3 = vrot.slane %v777_v2, 6  ;;  %538 = vmatmul.f32.vlgmr.msrb.gmra.mxu1 %v777_v2 }
 0x63b   :  { %v658_v5 = vsel %vm380_vm1, %v657_v4, %v640_v3 }
 0x6b6   :  { %v539_v7 = vpop.f32.mrf.mxu1 }
 0x6b7   :  { %v542_v8 = vadd.f32 %v539_v7, %v521_v6 }
 0x6b9   :  { %778 = vtanh.f32 %v542_v8 }
 0x6bf   :  { %v779_v9 = vpop.eup %778 }
 0x6c0   :  { %v643_v10 = vrot.slane %v779_v9, 5  ;;  %561 = vmatmul.f32.vlgmr.msrb.gmra.mxu2 %v779_v9 }
 0x6c2   :  { %v659_v11 = vsel %vm382_vm2, %v658_v5, %v643_v10 }
 0x743   :  { %v562_v13 = vpop.f32.mrf.mxu2 }
 0x744   :  { %v565_v14 = vadd.f32 %v562_v13, %v544_v12 }
 0x746   :  { %780 = vtanh.f32 %v565_v14 }
 0x74c   :  { %v781_v15 = vpop.eup %780 }
 0x74d   :  { %v646_v16 = vrot.slane %v781_v15, 4  ;;  %584 = vmatmul.f32.vlgmr.msrb.gmra.mxu3 %v781_v15 }
 0x74f   :  { %v660_v17 = vsel %vm384_vm3, %v659_v11, %v646_v16 }
 0x7d0   :  { %v585_v19 = vpop.f32.mrf.mxu3 }
 0x7d1   :  { %v588_v20 = vadd.f32 %v585_v19, %v567_v18 }
 0x7d3   :  { %782 = vtanh.f32 %v588_v20 }
 0x7d9   :  { %v783_v21 = vpop.eup %782 }
 0x7da   :  { %v649_v22 = vrot.slane %v783_v21, 3  ;;  %607 = vmatmul.f32.vlgmr.msra.gmra.mxu0 %v783_v21 }
 0x7dc   :  { %v661_v23 = vsel %vm386_vm4, %v660_v17, %v649_v22 }
 0x857   :  { %v608_v35 = vpop.f32.mrf.mxu0 }
 0x858   :  { %v611_v36 = vadd.f32 %v608_v35, %v590_v34 }
 0x85a   :  { %784 = vtanh.f32 %v611_v36 }
 0x860   :  { %v785_v37 = vpop.eup %784 }
 0x861   :  { %v652_v38 = vrot.slane %v785_v37, 2  ;;  %630 = vmatmul.f32.vlgmr.msra.gmra.mxu1 %v785_v37 }
 0x863   :  { %v662_v39 = vsel %vm388_vm5, %v661_v23, %v652_v38 }
 0x8de   :  { %v631_v47 = vpop.f32.mrf.mxu1 }
 0x8df   :  { %v634_v48 = vadd.f32 %v631_v47, %v613_v46 }
 0x8e1   :  { %786 = vtanh.f32 %v634_v48 }
 0x8e7   :  { %v787_v49 = vpop.eup %786 }
 0x8e8   :  { %665 = vst [vmem:[#allocation14 + $0x1] sm:$0x1] %v787_v49  ;;  %v655_v50 = vrot.slane %v787_v49, 1 }
 0x8e9   :  { %729 = dma.vmem_to_hbm [thread:$0]  %s725_s19, 32, %s727_s22, [#allocation15]  }
 0x8ea   :  { %v663_v51 = vsel %vm390_vm6, %v662_v39, %v655_v50 }
 0x8eb   :  { %703 = vmatmul.f32.vlgmr.msra.gmra.mxu2 %v663_v51 }
 0x96e   :  { %v704_v53 = vpop.f32.mrf.mxu2 }
 0x96f   :  { %v705_v54 = vadd.f32 %v755_v52, %v704_v53 }
 0x971   :  { %707 = vst [vmem:[#allocation13] sm:$0xff] %v705_v54 }
 0x972   :  { %718 = dma.vmem_to_hbm [thread:$0]  %s714_s26, 128, %s716_s28, [#allocation6]  }
 0x973   :  { %962 = dma.done.wait [#allocation6], 128  }
 0x974   :  { %963 = vsyncadd [#allocation6], 4294967168 }
 0x975   :  { %964 = dma.done.wait [#allocation15], 32  }
 0x976   :  { %965 = vsyncadd [#allocation15], 4294967264 }
 0x977   :  { %738 = vsyncpa [#allocation5], 1 }
 0x978   :  { %739 = vsyncpa [#allocation8], 1 }
 0x979   :  { %740 = vsyncpa [#allocation11], 1 }
 0x97a   :  { %741 = vsyncpa [#allocation6], 1 }
 0x97b   :  { %742 = vsyncpa [#allocation15], 1 }

</bundles_post_ra>
